<compile_context>
chip_gen: v6e
topology: v6e:2x2x1
jax: 0.10.0
libtpu: 0.0.40
codegen_flags: <defaults>
</compile_context>

<pallas_src>
import jax
import jax.numpy as jnp
from jax.experimental import pallas as pl
from jax.experimental.pallas import tpu as pltpu

TEXT_DIM = 1536          # fixed by SimpleText.__init__
_LANE = 128              # TPU lane width


def _round_up(a, m):
    return (a + m - 1) // m * m


# --------------------------------------------------------------------------- kernel
def simpletext_kernel(x_ref, w1_ref, b1_ref, w2_ref, b2_ref, w3_ref, b3_ref, o_ref):
    """One batch tile of the full SimpleText forward, fully resident in VMEM.

    x_ref : (TB, 1536) f32   (cast to bf16 in-kernel -> single f32 HBM read of x)
    w1_ref: (1536, H)  bf16  b1_ref: (1, H)    f32
    w2_ref: (H, H)     bf16  b2_ref: (1, H)    f32
    w3_ref: (H, 128)   bf16  b3_ref: (1, 128)  f32   (lane-padded once, outside hot path)
    o_ref : (TB, C)    f32   (only the real num_classes columns are written back)
    """
    x = x_ref[...].astype(jnp.bfloat16)

    # t_proj = relu(text_proj(x))  -- bf16 MXU matmul, f32 accumulate, f32 bias add
    h1 = jnp.dot(x, w1_ref[...], preferred_element_type=jnp.float32) + b1_ref[...]
    h1 = jnp.maximum(h1, 0.0).astype(jnp.bfloat16)

    # t_hidden = relu(hidden_layer(t_proj))
    h2 = jnp.dot(h1, w2_ref[...], preferred_element_type=jnp.float32) + b2_ref[...]
    h2 = jnp.maximum(h2, 0.0).astype(jnp.bfloat16)

    # logits = classifier(t_hidden): lane-dense padded matmul, narrow store of real classes
    logits = jnp.dot(h2, w3_ref[...], preferred_element_type=jnp.float32) + b3_ref[...]
    o_ref[...] = logits[:, : o_ref.shape[1]].astype(o_ref.dtype)


# --------------------------------------------------------------------------- wrapper
def _pick_batch_tile(B):
    if B < 256:
        return _round_up(B, 8)                 # single grid step (f32 sublane multiple)
    # >= 2 roughly-equal steps so v7x's two TensorCores both get work; cap at 512 rows
    # (f32 x tile 3 MiB x2 buffers = 6 MiB -> fits v5e's 16 MiB default scoped VMEM,
    # ~85% of HBM roofline per the measured tile-size sweep).
    return min(512, _round_up((B + 1) // 2, 128))


def prepare_params(w1, b1, w2, b2, w3, b3):
    """One-time (out of the hot path) conversion of (in, out)-layout Linear params into
    the kernel's persistent layout: bf16 weights, f32 biases, classifier lane-padded
    to a 128-wide MXU-friendly RHS."""
    D, H = w1.shape
    C = w3.shape[1]
    assert D == TEXT_DIM and w2.shape == (H, H) and w3.shape == (H, C)
    C_pad = _round_up(max(C, _LANE), _LANE)
    w3p = jnp.pad(w3, ((0, 0), (0, C_pad - C))) if C_pad != C else w3
    b3p = jnp.pad(b3, ((0, 0), (0, C_pad - C))) if C_pad != C else b3
    return dict(
        w1=w1.astype(jnp.bfloat16), b1=b1.astype(jnp.float32),
        w2=w2.astype(jnp.bfloat16), b2=b2.astype(jnp.float32),
        w3=w3p.astype(jnp.bfloat16), b3=b3p.astype(jnp.float32),
        num_classes=int(C),
    )


def simpletext_forward(x, params):
    """x: (B, 1536) float32 text features. Returns (B, num_classes) float32 logits."""
    B, D = x.shape
    assert D == TEXT_DIM
    w1, b1 = params["w1"], params["b1"]
    w2, b2 = params["w2"], params["b2"]
    w3, b3 = params["w3"], params["b3"]
    C = params["num_classes"]
    H = w1.shape[1]
    C_pad = w3.shape[1]

    tb = _pick_batch_tile(B)
    grid = (pl.cdiv(B, tb),)   # last block may be partial; output stores there are masked

    out = pl.pallas_call(
        simpletext_kernel,
        out_shape=jax.ShapeDtypeStruct((B, C), jnp.float32),
        grid=grid,
        in_specs=[
            pl.BlockSpec((tb, D), lambda i: (i, 0)),      # x tile (f32, cast in-kernel)
            pl.BlockSpec((D, H), lambda i: (0, 0)),       # W1: constant index -> resident
            pl.BlockSpec((1, H), lambda i: (0, 0)),       # b1
            pl.BlockSpec((H, H), lambda i: (0, 0)),       # W2
            pl.BlockSpec((1, H), lambda i: (0, 0)),       # b2
            pl.BlockSpec((H, C_pad), lambda i: (0, 0)),   # W3 (lane-padded, resident)
            pl.BlockSpec((1, C_pad), lambda i: (0, 0)),   # b3
        ],
        out_specs=pl.BlockSpec((tb, C), lambda i: (i, 0)),  # store only the real classes
        compiler_params=pltpu.CompilerParams(
            dimension_semantics=("parallel",),   # batch steps shard across TensorCores (v7x)
        ),
    )(x, w1, b1, w2, b2, w3, b3)
    return out


# --------------------------------------------------------------------------- init / refs
def init_params(key, text_dim, hidden_dim, num_classes):
    """Deterministic synthetic init (uniform, roughly PyTorch Linear scale).
    Weights are created directly in (in, out) layout: forward does x @ W + b."""
    k1, k2, k3, k4, k5, k6 = jax.random.split(key, 6)

    def lin(kw, kb, fan_in, fan_out):
        bound = 1.0 / jnp.sqrt(fan_in)
        w = jax.random.uniform(kw, (fan_in, fan_out), jnp.float32, -bound, bound)
        b = jax.random.uniform(kb, (1, fan_out), jnp.float32, -bound, bound)
        return w, b

    w1, b1 = lin(k1, k2, text_dim, hidden_dim)     # text_proj
    w2, b2 = lin(k3, k4, hidden_dim, hidden_dim)   # hidden_layer
    w3, b3 = lin(k5, k6, hidden_dim, num_classes)  # classifier
    return w1, b1, w2, b2, w3, b3


def reference_forward_bf16(x, w1, b1, w2, b2, w3, b3):
    """JAX reference with the same bf16-compute / f32-accumulate recipe as the kernel."""
    xb = x.astype(jnp.bfloat16)
    h1 = jnp.maximum(
        jnp.dot(xb, w1.astype(jnp.bfloat16), preferred_element_type=jnp.float32) + b1, 0.0
    ).astype(jnp.bfloat16)
    h2 = jnp.maximum(
        jnp.dot(h1, w2.astype(jnp.bfloat16), preferred_element_type=jnp.float32) + b2, 0.0
    ).astype(jnp.bfloat16)
    return jnp.dot(h2, w3.astype(jnp.bfloat16), preferred_element_type=jnp.float32) + b3


def reference_forward_f32(x, w1, b1, w2, b2, w3, b3):
    h1 = jnp.maximum(x @ w1 + b1, 0.0)
    h2 = jnp.maximum(h1 @ w2 + b2, 0.0)
    return h2 @ w3 + b3


# --------------------------------------------------------------------------- demo
if __name__ == "__main__":
    B = 8             # batch
    HIDDEN = 128      # opt.hidden_dim
    NUM_CLASSES = 16  # opt.num_classes

    key = jax.random.PRNGKey(0)
    k_x, k_p, k_x2 = jax.random.split(key, 3)

    raw_params = init_params(k_p, TEXT_DIM, HIDDEN, NUM_CLASSES)  # f32, (in, out) layout
    params = prepare_params(*raw_params)                          # one-time persistent layout

    text_feature = jax.random.normal(k_x, (B, TEXT_DIM), dtype=jnp.float32)
    logits = jax.block_until_ready(simpletext_forward(text_feature, params))
    assert logits.shape == (B, NUM_CLASSES), logits.shape

    # Tight check vs a JAX reference using the same bf16/f32 recipe.
    ref_bf16 = reference_forward_bf16(text_feature, *raw_params)
    assert jnp.allclose(logits, ref_bf16, atol=1e-2, rtol=1e-2), "mismatch vs bf16 JAX reference"

    # Looser sanity check vs the pure-f32 reference (bf16 quantization error only).
    ref_f32 = reference_forward_f32(text_feature, *raw_params)
    assert jnp.allclose(logits, ref_f32, atol=5e-2, rtol=5e-2), "mismatch vs f32 JAX reference"

    # Ragged batch: exercises the cdiv-grid partial last block / masked output store path.
    B2 = 37
    x2 = jax.random.normal(k_x2, (B2, TEXT_DIM), dtype=jnp.float32)
    logits2 = jax.block_until_ready(simpletext_forward(x2, params))
    assert logits2.shape == (B2, NUM_CLASSES), logits2.shape
    ref2 = reference_forward_bf16(x2, *raw_params)
    assert jnp.allclose(logits2, ref2, atol=1e-2, rtol=1e-2), "mismatch on ragged batch"

    print("KERNEL_OK")
</pallas_src>

<mosaic_0001>
module attributes {stable_mosaic.version = 11 : i64} {
  func.func @simpletext_kernel(%arg0: i32, %arg1: memref<8x1536xf32, #tpu.memory_space<vmem>>, %arg2: memref<1536x128xbf16, #tpu.memory_space<vmem>>, %arg3: memref<1x128xf32, #tpu.memory_space<vmem>>, %arg4: memref<128x128xbf16, #tpu.memory_space<vmem>>, %arg5: memref<1x128xf32, #tpu.memory_space<vmem>>, %arg6: memref<128x128xbf16, #tpu.memory_space<vmem>>, %arg7: memref<1x128xf32, #tpu.memory_space<vmem>>, %arg8: memref<8x16xf32, #tpu.memory_space<vmem>>) attributes {dimension_semantics = [#tpu.dimension_semantics<parallel>], iteration_bounds = array<i64: 1>, scalar_prefetch = 0 : i64, scratch_operands = 0 : i64, tpu.core_type = #tpu.core_type<tc>, window_params = [{transform_indices = @transform_0, window_bounds = array<i64: 8, 1536>}, {pipeline_mode = #tpu.pipeline_mode<synchronous>, transform_indices = @transform_1, window_bounds = array<i64: 1536, 128>}, {pipeline_mode = #tpu.pipeline_mode<synchronous>, transform_indices = @transform_2, window_bounds = array<i64: 1, 128>}, {pipeline_mode = #tpu.pipeline_mode<synchronous>, transform_indices = @transform_3, window_bounds = array<i64: 128, 128>}, {pipeline_mode = #tpu.pipeline_mode<synchronous>, transform_indices = @transform_4, window_bounds = array<i64: 1, 128>}, {pipeline_mode = #tpu.pipeline_mode<synchronous>, transform_indices = @transform_5, window_bounds = array<i64: 128, 128>}, {pipeline_mode = #tpu.pipeline_mode<synchronous>, transform_indices = @transform_6, window_bounds = array<i64: 1, 128>}, {transform_indices = @transform_7, window_bounds = array<i64: 8, 16>}]} {
    %c0 = arith.constant 0 : index
    %c0_0 = arith.constant 0 : index
    %0 = vector.load %arg1[%c0, %c0_0] : memref<8x1536xf32, #tpu.memory_space<vmem>>, vector<8x1536xf32>
    %1 = arith.truncf %0 : vector<8x1536xf32> to vector<8x1536xbf16>
    %c0_1 = arith.constant 0 : index
    %c0_2 = arith.constant 0 : index
    %2 = vector.load %arg2[%c0_1, %c0_2] : memref<1536x128xbf16, #tpu.memory_space<vmem>>, vector<1536x128xbf16>
    %cst = arith.constant dense<0.000000e+00> : vector<8x128xf32>
    %3 = tpu.matmul %1, %2, %cst {dimension_numbers = #tpu.dot_dimension_numbers<[1], [0], [0], [1], [0, 0, 1, 1], [], []>} : vector<8x1536xbf16>, vector<1536x128xbf16>, vector<8x128xf32> -> vector<8x128xf32>
    %c0_3 = arith.constant 0 : index
    %c0_4 = arith.constant 0 : index
    %4 = vector.load %arg3[%c0_3, %c0_4] : memref<1x128xf32, #tpu.memory_space<vmem>>, vector<1x128xf32>
    %5 = vector.broadcast %4 : vector<1x128xf32> to vector<8x128xf32>
    %6 = arith.addf %3, %5 : vector<8x128xf32>
    %cst_5 = arith.constant 0.000000e+00 : f32
    %7 = vector.broadcast %cst_5 : f32 to vector<8x128xf32>
    %8 = arith.maximumf %6, %7 : vector<8x128xf32>
    %9 = arith.truncf %8 : vector<8x128xf32> to vector<8x128xbf16>
    %c0_6 = arith.constant 0 : index
    %c0_7 = arith.constant 0 : index
    %10 = vector.load %arg4[%c0_6, %c0_7] : memref<128x128xbf16, #tpu.memory_space<vmem>>, vector<128x128xbf16>
    %cst_8 = arith.constant dense<0.000000e+00> : vector<8x128xf32>
    %11 = tpu.matmul %9, %10, %cst_8 {dimension_numbers = #tpu.dot_dimension_numbers<[1], [0], [0], [1], [0, 0, 1, 1], [], []>} : vector<8x128xbf16>, vector<128x128xbf16>, vector<8x128xf32> -> vector<8x128xf32>
    %c0_9 = arith.constant 0 : index
    %c0_10 = arith.constant 0 : index
    %12 = vector.load %arg5[%c0_9, %c0_10] : memref<1x128xf32, #tpu.memory_space<vmem>>, vector<1x128xf32>
    %13 = vector.broadcast %12 : vector<1x128xf32> to vector<8x128xf32>
    %14 = arith.addf %11, %13 : vector<8x128xf32>
    %cst_11 = arith.constant 0.000000e+00 : f32
    %15 = vector.broadcast %cst_11 : f32 to vector<8x128xf32>
    %16 = arith.maximumf %14, %15 : vector<8x128xf32>
    %17 = arith.truncf %16 : vector<8x128xf32> to vector<8x128xbf16>
    %c0_12 = arith.constant 0 : index
    %c0_13 = arith.constant 0 : index
    %18 = vector.load %arg6[%c0_12, %c0_13] : memref<128x128xbf16, #tpu.memory_space<vmem>>, vector<128x128xbf16>
    %cst_14 = arith.constant dense<0.000000e+00> : vector<8x128xf32>
    %19 = tpu.matmul %17, %18, %cst_14 {dimension_numbers = #tpu.dot_dimension_numbers<[1], [0], [0], [1], [0, 0, 1, 1], [], []>} : vector<8x128xbf16>, vector<128x128xbf16>, vector<8x128xf32> -> vector<8x128xf32>
    %c0_15 = arith.constant 0 : index
    %c0_16 = arith.constant 0 : index
    %20 = vector.load %arg7[%c0_15, %c0_16] : memref<1x128xf32, #tpu.memory_space<vmem>>, vector<1x128xf32>
    %21 = vector.broadcast %20 : vector<1x128xf32> to vector<8x128xf32>
    %22 = arith.addf %19, %21 : vector<8x128xf32>
    %23 = vector.extract_strided_slice %22 {offsets = [0, 0], sizes = [8, 16], strides = [1, 1]} : vector<8x128xf32> to vector<8x16xf32>
    %c0_17 = arith.constant 0 : index
    %c0_18 = arith.constant 0 : index
    %24 = vector.load %arg8[%c0_17, %c0_18] : memref<8x16xf32, #tpu.memory_space<vmem>>, vector<8x16xf32>
    tpu.vector_store %arg8[%c0_17, %c0_18], %23 {strides = array<i32>} : memref<8x16xf32, #tpu.memory_space<vmem>>, vector<8x16xf32>,
    return
  }
  func.func @transform_0(%arg0: i32) -> (i32, i32) {
    %c0_i32 = arith.constant 0 : i32
    %c0_i32_0 = arith.constant 0 : i32
    return %arg0, %c0_i32 : i32, i32
  }
  func.func @transform_1(%arg0: i32) -> (i32, i32) {
    %c0_i32 = arith.constant 0 : i32
    %c0_i32_0 = arith.constant 0 : i32
    %c0_i32_1 = arith.constant 0 : i32
    return %c0_i32, %c0_i32_0 : i32, i32
  }
  func.func @transform_2(%arg0: i32) -> (i32, i32) {
    %c0_i32 = arith.constant 0 : i32
    %c0_i32_0 = arith.constant 0 : i32
    %c0_i32_1 = arith.constant 0 : i32
    return %c0_i32, %c0_i32_0 : i32, i32
  }
  func.func @transform_3(%arg0: i32) -> (i32, i32) {
    %c0_i32 = arith.constant 0 : i32
    %c0_i32_0 = arith.constant 0 : i32
    %c0_i32_1 = arith.constant 0 : i32
    return %c0_i32, %c0_i32_0 : i32, i32
  }
  func.func @transform_4(%arg0: i32) -> (i32, i32) {
    %c0_i32 = arith.constant 0 : i32
    %c0_i32_0 = arith.constant 0 : i32
    %c0_i32_1 = arith.constant 0 : i32
    return %c0_i32, %c0_i32_0 : i32, i32
  }
  func.func @transform_5(%arg0: i32) -> (i32, i32) {
    %c0_i32 = arith.constant 0 : i32
    %c0_i32_0 = arith.constant 0 : i32
    %c0_i32_1 = arith.constant 0 : i32
    return %c0_i32, %c0_i32_0 : i32, i32
  }
  func.func @transform_6(%arg0: i32) -> (i32, i32) {
    %c0_i32 = arith.constant 0 : i32
    %c0_i32_0 = arith.constant 0 : i32
    %c0_i32_1 = arith.constant 0 : i32
    return %c0_i32, %c0_i32_0 : i32, i32
  }
  func.func @transform_7(%arg0: i32) -> (i32, i32) {
    %c0_i32 = arith.constant 0 : i32
    %c0_i32_0 = arith.constant 0 : i32
    return %arg0, %c0_i32 : i32, i32
  }
}

</mosaic_0001>

<bundles_post_ra>
// kernel: tpu_custom_call.1
= control target key start
LH: loop header
LB: loop body
LE: loop exit
PB: predicated region body
PF: predicated region fallthrough
CT: control target
= control target key end

     0   :  { %12 = vsyncpa [#allocation3], 0  ;;  %s1999_s0 = inlined_call_operand.hbm [shape: f32[8,1536], index: 0, kind: input, shape index: {}]   ;;  %s2000_s1 = inlined_call_operand.hbm [shape: bf16[1536,128], index: 1, kind: input, shape index: {}]   ;;  %s2001_s2 = inlined_call_operand.vmem [shape: f32[1,128], index: 2, kind: input, shape index: {}]   ;;  %s2002_s3 = inlined_call_operand.hbm [shape: bf16[128,128], index: 3, kind: input, shape index: {}]   ;;  %s2003_s4 = inlined_call_operand.vmem [shape: f32[1,128], index: 4, kind: input, shape index: {}]   ;;  %s2004_s5 = inlined_call_operand.hbm [shape: bf16[128,128], index: 5, kind: input, shape index: {}]   ;;  %s2005_s6 = inlined_call_operand.vmem [shape: f32[1,128], index: 6, kind: input, shape index: {}]   ;;  %s2006_s7 = inlined_call_operand.hbm [shape: f32[8,16], index: 7, kind: output, shape index: {}]  }
   0x1   :  { %13 = vsyncpa [#allocation6], 0 }
   0x2   :  { %14 = vsyncpa [#allocation9], 0 }
   0x3   :  { %15 = vsyncpa [#allocation4], 0  ;;  %s1899_s24 = smov [#allocation5]  }
   0x4   :  { %s31_s25 = sshll.u32 %s1899_s24, 4  ;;  %s32_s25 = int_to_ptr.vmem [resolvable:$true] %s31_s25 }
   0x5   :  { %s1799_s26 = scalar_lea.vmem %s32_s25, 12288  ;;  %p1804_p1 = scmp.lt.s32.totalorder %s32_s25, %s32_s25 }
   0x6   :  { %p1800_p0 = scmp.ne.s32.totalorder %s32_s25, %s1799_s26  ;;  %p1805_p2 = scmp.lt.s32.totalorder %s1799_s26, %s1799_s26 }
   0x8   :  { %p1806_p3 = por %p1805_p2, %p1804_p1 }
   0xa   :  { %p1807_p4 = pnand %p1806_p3, %p1800_p0 }
   0xc   :  { %1810 = shalt.err (!%p1807_p4)
}
   0xd   :  { %s1900_s27 = smov 64   ;;  %s1901_s28 = smov 4  }
   0xe   :  { %37 = dma.hbm_to_vmem [thread:$0]  %s2000_s1, 12288, %s32_s25, [#allocation6], %s1900_s27, %s1900_s27, %s1901_s28  }
   0xf   :  { %s1902_s8 = smov [#allocation2]   ;;  %s1903_s10 = smov [#allocation7]  }
  0x10   :  { %s22_s9 = sshll.u32 %s1902_s8, 4  ;;  %s45_s11 = sshll.u32 %s1903_s10, 4  ;;  %s23_s9 = int_to_ptr.vmem [resolvable:$true] %s22_s9  ;;  %s46_s11 = int_to_ptr.vmem [resolvable:$true] %s45_s11 }
  0x11   :  { %s1819_s12 = scalar_lea.vmem %s23_s9, 1536  ;;  %p1824_p6 = scmp.lt.s32.totalorder %s23_s9, %s23_s9 }
  0x12   :  { %p1820_p5 = scmp.ne.s32.totalorder %s23_s9, %s1819_s12  ;;  %p1825_p7 = scmp.lt.s32.totalorder %s1819_s12, %s1819_s12 }
  0x14   :  { %p1826_p8 = por %p1825_p7, %p1824_p6 }
  0x16   :  { %p1827_p9 = pnand %p1826_p8, %p1820_p5 }
  0x18   :  { %1830 = shalt.err (!%p1827_p9)
}
  0x19   :  { %25 = dma.hbm_to_vmem [thread:$0]  %s1999_s0, 1536, %s23_s9, [#allocation3]  }
  0x1a   :  { %s1839_s15 = scalar_lea.vmem %s46_s11, 1024  ;;  %p1844_p11 = scmp.lt.s32.totalorder %s46_s11, %s46_s11 }
  0x1b   :  { %p1840_p10 = scmp.ne.s32.totalorder %s46_s11, %s1839_s15  ;;  %p1845_p12 = scmp.lt.s32.totalorder %s1839_s15, %s1839_s15 }
  0x1d   :  { %p1846_p13 = por %p1845_p12, %p1844_p11 }
  0x1f   :  { %p1847_p0 = pnand %p1846_p13, %p1840_p10 }
  0x21   :  { %1850 = shalt.err (!%p1847_p0)
}
  0x22   :  { %51 = dma.hbm_to_vmem [thread:$0]  %s2002_s3, 1024, %s46_s11, [#allocation6], %s1900_s27, %s1900_s27, %s1901_s28  }
  0x23   :  { %s1904_s17 = smov [#allocation8]  }
  0x24   :  { %s59_s18 = sshll.u32 %s1904_s17, 4  ;;  %s60_s18 = int_to_ptr.vmem [resolvable:$true] %s59_s18 }
  0x25   :  { %s1859_s19 = scalar_lea.vmem %s60_s18, 1024  ;;  %p1864_p2 = scmp.lt.s32.totalorder %s60_s18, %s60_s18 }
  0x26   :  { %p1860_p1 = scmp.ne.s32.totalorder %s60_s18, %s1859_s19  ;;  %p1865_p3 = scmp.lt.s32.totalorder %s1859_s19, %s1859_s19 }
  0x28   :  { %p1866_p4 = por %p1865_p3, %p1864_p2 }
  0x2a   :  { %p1867_p5 = pnand %p1866_p4, %p1860_p1 }
  0x2c   :  { %1870 = shalt.err (!%p1867_p5)
}
  0x2d   :  { %65 = dma.hbm_to_vmem [thread:$0]  %s2004_s5, 1024, %s60_s18, [#allocation9], %s1900_s27, %s1900_s27, %s1901_s28  }
  0x2e   :  { %1891 = dma.done.wait [#allocation3], 1536  }
  0x2f   :  { %1892 = vsyncadd [#allocation3], 4294965760 }
  0x30   :  { %1893 = dma.done.wait [#allocation6], 13312  }
  0x31   :  { %1894 = vsyncadd [#allocation6], 4294953984 }
  0x32   :  { %1895 = dma.done.wait [#allocation9], 1024  }
  0x33   :  { %1896 = vsyncadd [#allocation9], 4294966272  ;;  %v1679_v0 = vld [vmem:[#allocation5 + $0x78] sm:$0xff]   ;;  %v1683_v4 = vld [vmem:[#allocation5 + $0x70] sm:$0xff]   ;;  %vm1906_vm0 = vmmov 0   ;;  %s1907_s24 = smov [#allocation10]  }
  0x34   :  { %v1680_v1 = vld [vmem:[#allocation5 + $0xf8] sm:$0xff]   ;;  %1480 = vmatprep.subr.bf16.mxu0 %v1679_v0  ;;  %v1684_v5 = vld [vmem:[#allocation5 + $0xf0] sm:$0xff]   ;;  %v1687_v8 = vld [vmem:[#allocation5 + $0x68] sm:$0xff]   ;;  %s1354_s25 = sshll.u32 %s1907_s24, 4  ;;  %vm1346_vm1 = vcmask 130048   ;;  %s1355_s25 = int_to_ptr.vmem [resolvable:$true] %s1354_s25 }
  0x35   :  { %v1681_v2 = vld [vmem:[#allocation5 + $0x38] sm:$0xff]   ;;  %1502 = vmatprep.subr.bf16.mxu1 %v1680_v1  ;;  %v1685_v6 = vld [vmem:[#allocation5 + $0x30] sm:$0xff]   ;;  %v1688_v9 = vld [vmem:[#allocation5 + $0xe8] sm:$0xff]   ;;  %p1876_p7 = scmp.lt.s32.totalorder %s1355_s25, %s1355_s25 }
  0x36   :  { %v1682_v3 = vld [vmem:[#allocation5 + $0xb8] sm:$0xff]   ;;  %1481 = vmatpush3.bf16.msra.mxu0 %v1681_v2  ;;  %v1686_v7 = vld [vmem:[#allocation5 + $0xb0] sm:$0xff]   ;;  %v1689_v10 = vld [vmem:[#allocation5 + $0x28] sm:$0xff]  }
  0x37   :  { %1503 = vmatpush3.bf16.msra.mxu1 %v1682_v3  ;;  %1482 = vmatprep.subr.bf16.mxu0 %v1683_v4  ;;  %v1690_v11 = vld [vmem:[#allocation5 + $0xa8] sm:$0xff]   ;;  %v1691_v12 = vld [vmem:[#allocation5 + $0x60] sm:$0xff]   ;;  %v1695_v16 = vld [vmem:[#allocation5 + $0x58] sm:$0xff]  }
  0x38   :  { %1504 = vmatprep.subr.bf16.mxu1 %v1684_v5  ;;  %v1692_v13 = vld [vmem:[#allocation5 + $0xe0] sm:$0xff]   ;;  %v1696_v17 = vld [vmem:[#allocation5 + $0xd8] sm:$0xff]   ;;  %v1699_v20 = vld [vmem:[#allocation5 + $0x50] sm:$0xff]  }
  0x39   :  { %v1693_v14 = vld [vmem:[#allocation5 + $0x20] sm:$0xff]   ;;  %v1697_v18 = vld [vmem:[#allocation5 + $0x18] sm:$0xff]   ;;  %v1700_v21 = vld [vmem:[#allocation5 + $0xd0] sm:$0xff]  }
  0x3a   :  { %1483 = vmatpush3.bf16.msra.mxu0 %v1685_v6  ;;  %v1694_v15 = vld [vmem:[#allocation5 + $0xa0] sm:$0xff]   ;;  %v1698_v19 = vld [vmem:[#allocation5 + $0x98] sm:$0xff]   ;;  %v1701_v22 = vld [vmem:[#allocation5 + $0x10] sm:$0xff]  }
  0x3b   :  { %1505 = vmatpush3.bf16.msra.mxu1 %v1686_v7  ;;  %1484 = vmatprep.subr.bf16.mxu0 %v1687_v8  ;;  %v1702_v23 = vld [vmem:[#allocation5 + $0x90] sm:$0xff]   ;;  %v1703_v24 = vld [vmem:[#allocation5 + $0x48] sm:$0xff]   ;;  %v1707_v28 = vld [vmem:[#allocation5 + $0x40] sm:$0xff]  }
  0x3c   :  { %1506 = vmatprep.subr.bf16.mxu1 %v1688_v9  ;;  %v1704_v25 = vld [vmem:[#allocation5 + $0xc8] sm:$0xff]   ;;  %v1708_v29 = vld [vmem:[#allocation5 + $0xc0] sm:$0xff]   ;;  %v84_v33 = vld [vmem:[#allocation2 + $0x18] sm:$0xff] }
  0x3d   :  { %v1705_v26 = vld [vmem:[#allocation5 + $0x8] sm:$0xff]   ;;  %v1709_v30 = vld [vmem:[#allocation5] sm:$0xff]   ;;  %v96_v36 = vpack.c.bf16 %v84_v33, %v84_v33  ;;  %v83_v38 = vld [vmem:[#allocation2 + $0x10] sm:$0xff] }
  0x3e   :  { %1485 = vmatpush3.bf16.msra.mxu0 %v1689_v10  ;;  %v1706_v27 = vld [vmem:[#allocation5 + $0x88] sm:$0xff]   ;;  %v1710_v31 = vld [vmem:[#allocation5 + $0x80] sm:$0xff]   ;;  %v95_v39 = vpack.c.bf16 %v83_v38, %v83_v38  ;;  %v1711_v40 = vld [vmem:[#allocation5 + $0x178] sm:$0xff]  }
  0x3f   :  { %1507 = vmatpush3.bf16.msra.mxu1 %v1690_v11  ;;  %1486 = vmatprep.subr.bf16.mxu0 %v1691_v12  ;;  %v82_v32 = vld [vmem:[#allocation2 + $0x8] sm:$0xff]  ;;  %v81_v34 = vld [vmem:[#allocation2] sm:$0xff]  ;;  %v1712_v41 = vld [vmem:[#allocation5 + $0x1f8] sm:$0xff]  }
  0x40   :  { %1508 = vmatprep.subr.bf16.mxu1 %v1692_v13  ;;  %v94_v35 = vpack.c.bf16 %v82_v32, %v82_v32  ;;  %v93_v37 = vpack.c.bf16 %v81_v34, %v81_v34  ;;  %952 = vmatprep.mubr.bf16.mxu1 %v96_v36  ;;  %v1713_v42 = vld [vmem:[#allocation5 + $0x138] sm:$0xff]   ;;  %v1715_v44 = vld [vmem:[#allocation5 + $0x170] sm:$0xff]   ;;  %v1719_v48 = vld [vmem:[#allocation5 + $0x168] sm:$0xff]  }
  0x41   :  { %v1714_v43 = vld [vmem:[#allocation5 + $0x1b8] sm:$0xff]   ;;  %v1716_v45 = vld [vmem:[#allocation5 + $0x1f0] sm:$0xff]   ;;  %v1720_v49 = vld [vmem:[#allocation5 + $0x1e8] sm:$0xff]  }
  0x42   :  { %1487 = vmatpush3.bf16.msra.mxu0 %v1693_v14  ;;  %912 = vmatprep.mubr.bf16.mxu0 %v94_v35  ;;  %v1717_v46 = vld [vmem:[#allocation5 + $0x130] sm:$0xff]   ;;  %v1721_v50 = vld [vmem:[#allocation5 + $0x128] sm:$0xff]   ;;  %v1723_v52 = vld [vmem:[#allocation5 + $0x160] sm:$0xff]  }
  0x43   :  { %1509 = vmatpush3.bf16.msra.mxu1 %v1694_v15  ;;  %1488 = vmatprep.subr.bf16.mxu0 %v1695_v16  ;;  %v1718_v47 = vld [vmem:[#allocation5 + $0x1b0] sm:$0xff]   ;;  %v1722_v51 = vld [vmem:[#allocation5 + $0x1a8] sm:$0xff]   ;;  %v1724_v53 = vld [vmem:[#allocation5 + $0x1e0] sm:$0xff]  }
  0x44   :  { %1510 = vmatprep.subr.bf16.mxu1 %v1696_v17  ;;  %v1725_v54 = vld [vmem:[#allocation5 + $0x120] sm:$0xff]   ;;  %v1727_v56 = vld [vmem:[#allocation5 + $0x158] sm:$0xff]   ;;  %v1731_v60 = vld [vmem:[#allocation5 + $0x150] sm:$0xff]  }
  0x45   :  { %v1726_v55 = vld [vmem:[#allocation5 + $0x1a0] sm:$0xff]   ;;  %v1728_v57 = vld [vmem:[#allocation5 + $0x1d8] sm:$0xff]   ;;  %v1732_v61 = vld [vmem:[#allocation5 + $0x1d0] sm:$0xff]  }
  0x46   :  { %1489 = vmatpush3.bf16.msra.mxu0 %v1697_v18  ;;  %v1729_v58 = vld [vmem:[#allocation5 + $0x118] sm:$0xff]   ;;  %v1733_v62 = vld [vmem:[#allocation5 + $0x110] sm:$0xff]   ;;  %v1735_v0 = vld [vmem:[#allocation5 + $0x148] sm:$0xff]  }
  0x47   :  { %1511 = vmatpush3.bf16.msra.mxu1 %v1698_v19  ;;  %1490 = vmatprep.subr.bf16.mxu0 %v1699_v20  ;;  %v1730_v59 = vld [vmem:[#allocation5 + $0x198] sm:$0xff]   ;;  %v1734_v63 = vld [vmem:[#allocation5 + $0x190] sm:$0xff]   ;;  %v1736_v1 = vld [vmem:[#allocation5 + $0x1c8] sm:$0xff]  }
  0x48   :  { %1512 = vmatprep.subr.bf16.mxu1 %v1700_v21  ;;  %v1737_v2 = vld [vmem:[#allocation5 + $0x108] sm:$0xff]   ;;  %v1739_v4 = vld [vmem:[#allocation5 + $0x140] sm:$0xff]   ;;  %v88_v9 = vld [vmem:[#allocation2 + $0x38] sm:$0xff] }
  0x49   :  { %v1738_v3 = vld [vmem:[#allocation5 + $0x188] sm:$0xff]   ;;  %v1740_v5 = vld [vmem:[#allocation5 + $0x1c0] sm:$0xff]   ;;  %v100_v11 = vpack.c.bf16 %v88_v9, %v88_v9  ;;  %v87_v13 = vld [vmem:[#allocation2 + $0x30] sm:$0xff] }
  0x4a   :  { %1491 = vmatpush3.bf16.msra.mxu0 %v1701_v22  ;;  %v1741_v6 = vld [vmem:[#allocation5 + $0x100] sm:$0xff]   ;;  %v86_v8 = vld [vmem:[#allocation2 + $0x28] sm:$0xff]  ;;  %v99_v15 = vpack.c.bf16 %v87_v13, %v87_v13  ;;  %v1743_v16 = vld [vmem:[#allocation5 + $0x278] sm:$0xff]  }
  0x4b   :  { %1513 = vmatpush3.bf16.msra.mxu1 %v1702_v23  ;;  %1492 = vmatprep.subr.bf16.mxu0 %v1703_v24  ;;  %v1742_v7 = vld [vmem:[#allocation5 + $0x180] sm:$0xff]   ;;  %v98_v10 = vpack.c.bf16 %v86_v8, %v86_v8  ;;  %v1744_v17 = vld [vmem:[#allocation5 + $0x2f8] sm:$0xff]   ;;  %v1747_v20 = vld [vmem:[#allocation5 + $0x270] sm:$0xff]  }
  0x4c   :  { %1514 = vmatprep.subr.bf16.mxu1 %v1704_v25  ;;  %v85_v12 = vld [vmem:[#allocation2 + $0x20] sm:$0xff]  ;;  %v1745_v18 = vld [vmem:[#allocation5 + $0x238] sm:$0xff]   ;;  %v1748_v21 = vld [vmem:[#allocation5 + $0x2f0] sm:$0xff]  }
  0x4d   :  { %v97_v14 = vpack.c.bf16 %v85_v12, %v85_v12  ;;  %v1746_v19 = vld [vmem:[#allocation5 + $0x2b8] sm:$0xff]   ;;  %v1749_v22 = vld [vmem:[#allocation5 + $0x230] sm:$0xff]   ;;  %v1751_v24 = vld [vmem:[#allocation5 + $0x268] sm:$0xff]  }
  0x4e   :  { %1493 = vmatpush3.bf16.msra.mxu0 %v1705_v26  ;;  %v1750_v23 = vld [vmem:[#allocation5 + $0x2b0] sm:$0xff]   ;;  %v1752_v25 = vld [vmem:[#allocation5 + $0x2e8] sm:$0xff]   ;;  %v1759_v32 = vld [vmem:[#allocation5 + $0x258] sm:$0xff]  }
  0x4f   :  { %1515 = vmatpush3.bf16.msra.mxu1 %v1706_v27  ;;  %1494 = vmatprep.subr.bf16.mxu0 %v1707_v28  ;;  %v1753_v26 = vld [vmem:[#allocation5 + $0x228] sm:$0xff]   ;;  %v1755_v28 = vld [vmem:[#allocation5 + $0x260] sm:$0xff]   ;;  %v1760_v33 = vld [vmem:[#allocation5 + $0x2d8] sm:$0xff]  }
  0x50   :  { %1516 = vmatprep.subr.bf16.mxu1 %v1708_v29  ;;  %v1754_v27 = vld [vmem:[#allocation5 + $0x2a8] sm:$0xff]   ;;  %v1756_v29 = vld [vmem:[#allocation5 + $0x2e0] sm:$0xff]   ;;  %v1761_v34 = vld [vmem:[#allocation5 + $0x218] sm:$0xff]  }
  0x51   :  { %v1762_v35 = vld [vmem:[#allocation5 + $0x298] sm:$0xff]   ;;  %v1763_v36 = vld [vmem:[#allocation5 + $0x250] sm:$0xff]  }
  0x52   :  { %1495 = vmatpush3.bf16.msra.mxu0 %v1709_v30  ;;  %v1757_v30 = vld [vmem:[#allocation5 + $0x220] sm:$0xff]   ;;  %v1765_v38 = vld [vmem:[#allocation5 + $0x210] sm:$0xff]  }
  0x53   :  { %1517 = vmatpush3.bf16.msra.mxu1 %v1710_v31  ;;  %1524 = vmatprep.subr.bf16.mxu0 %v1711_v40  ;;  %v1758_v31 = vld [vmem:[#allocation5 + $0x2a0] sm:$0xff]   ;;  %v1767_v40 = vld [vmem:[#allocation5 + $0x248] sm:$0xff]  }
  0x54   :  { %1546 = vmatprep.subr.bf16.mxu1 %v1712_v41  ;;  %v1768_v41 = vld [vmem:[#allocation5 + $0x2c8] sm:$0xff]  }
  0x55   :  { %913 = vmatmul.mubr.bf16.vlgmr.msra.gmra.mxu0 %v93_v37  ;;  %v1764_v37 = vld [vmem:[#allocation5 + $0x2d0] sm:$0xff]  }
  0x56   :  { %953 = vmatmul.mubr.bf16.vlgmr.msra.gmra.mxu1 %v95_v39  ;;  %1525 = vmatpush3.bf16.msra.mxu0 %v1713_v42  ;;  %v1766_v39 = vld [vmem:[#allocation5 + $0x290] sm:$0xff]   ;;  %v1769_v42 = vld [vmem:[#allocation5 + $0x208] sm:$0xff]  }
  0x57   :  { %1547 = vmatpush3.bf16.msra.mxu1 %v1714_v43  ;;  %1526 = vmatprep.subr.bf16.mxu0 %v1715_v44  ;;  %v1770_v43 = vld [vmem:[#allocation5 + $0x288] sm:$0xff]   ;;  %v1771_v44 = vld [vmem:[#allocation5 + $0x240] sm:$0xff]  }
  0x58   :  { %1548 = vmatprep.subr.bf16.mxu1 %v1716_v45  ;;  %992 = vmatprep.mubr.bf16.mxu0 %v98_v10  ;;  %v1772_v45 = vld [vmem:[#allocation5 + $0x2c0] sm:$0xff]  }
  0x59   :  { %1032 = vmatprep.mubr.bf16.mxu1 %v100_v11 }
  0x5a   :  { %1527 = vmatpush3.bf16.msra.mxu0 %v1717_v46  ;;  %v1773_v46 = vld [vmem:[#allocation5 + $0x200] sm:$0xff]  }
  0x5b   :  { %1549 = vmatpush3.bf16.msra.mxu1 %v1718_v47  ;;  %1528 = vmatprep.subr.bf16.mxu0 %v1719_v48  ;;  %v1774_v47 = vld [vmem:[#allocation5 + $0x280] sm:$0xff]   ;;  %v90_v48 = vld [vmem:[#allocation2 + $0x48] sm:$0xff] }
  0x5c   :  { %1550 = vmatprep.subr.bf16.mxu1 %v1720_v49  ;;  %v102_v49 = vpack.c.bf16 %v90_v48, %v90_v48  ;;  %v1462_v48 = vld [vmem:[%s2003_s4] ss:$0 sm:$0xff]  ;;  %s1871_s4 = scalar_lea.vmem %s1355_s25, 128 }
  0x5d   :  { %p1872_p6 = scmp.ne.s32.totalorder %s1355_s25, %s1871_s4  ;;  %p1877_p8 = scmp.lt.s32.totalorder %s1871_s4, %s1871_s4 }
  0x5e   :  { %1529 = vmatpush3.bf16.msra.mxu0 %v1721_v50  ;;  %v92_v50 = vld [vmem:[#allocation2 + $0x58] sm:$0xff] }
  0x5f   :  { %1551 = vmatpush3.bf16.msra.mxu1 %v1722_v51  ;;  %1530 = vmatprep.subr.bf16.mxu0 %v1723_v52  ;;  %v89_v51 = vld [vmem:[#allocation2 + $0x40] sm:$0xff]  ;;  %v91_v52 = vld [vmem:[#allocation2 + $0x50] sm:$0xff]  ;;  %p1878_p9 = por %p1877_p8, %p1876_p7 }
  0x60   :  { %1552 = vmatprep.subr.bf16.mxu1 %v1724_v53  ;;  %v104_v53 = vpack.c.bf16 %v92_v50, %v92_v50 }
  0x61   :  { %p1879_p10 = pnand %p1878_p9, %p1872_p6 }
  0x62   :  { %1531 = vmatpush3.bf16.msra.mxu0 %v1725_v54  ;;  %v101_v54 = vpack.c.bf16 %v89_v51, %v89_v51 }
  0x63   :  { %1553 = vmatpush3.bf16.msra.mxu1 %v1726_v55  ;;  %1532 = vmatprep.subr.bf16.mxu0 %v1727_v56  ;;  %v103_v55 = vpack.c.bf16 %v91_v52, %v91_v52  ;;  %v1775_v56 = vld [vmem:[#allocation7 + $0x38] sm:$0xff]  }
  0x64   :  { %1554 = vmatprep.subr.bf16.mxu1 %v1728_v57  ;;  %v1905_v57 = vmov 0.0  }
  0x66   :  { %1533 = vmatpush3.bf16.msra.mxu0 %v1729_v58  ;;  %v1776_v58 = vld [vmem:[#allocation7 + $0x30] sm:$0xff]  }
  0x67   :  { %1555 = vmatpush3.bf16.msra.mxu1 %v1730_v59  ;;  %1534 = vmatprep.subr.bf16.mxu0 %v1731_v60  ;;  %v1777_v59 = vld [vmem:[#allocation7 + $0x28] sm:$0xff]   ;;  %v1778_v60 = vld [vmem:[#allocation7 + $0x20] sm:$0xff]  }
  0x68   :  { %1556 = vmatprep.subr.bf16.mxu1 %v1732_v61  ;;  %v1779_v61 = vld [vmem:[#allocation7 + $0x18] sm:$0xff]  }
  0x6a   :  { %1535 = vmatpush3.bf16.msra.mxu0 %v1733_v62  ;;  %v1780_v62 = vld [vmem:[#allocation7 + $0x10] sm:$0xff]  }
  0x6b   :  { %1557 = vmatpush3.bf16.msra.mxu1 %v1734_v63  ;;  %1536 = vmatprep.subr.bf16.mxu0 %v1735_v0  ;;  %v1781_v63 = vld [vmem:[#allocation7 + $0x8] sm:$0xff]   ;;  %v1782_v0 = vld [vmem:[#allocation7] sm:$0xff]  }
  0x6c   :  { %1558 = vmatprep.subr.bf16.mxu1 %v1736_v1  ;;  %v1783_v1 = vld [vmem:[#allocation8 + $0x38] sm:$0xff]  }
  0x6e   :  { %1537 = vmatpush3.bf16.msra.mxu0 %v1737_v2  ;;  %v1784_v2 = vld [vmem:[#allocation8 + $0x30] sm:$0xff]  }
  0x6f   :  { %1559 = vmatpush3.bf16.msra.mxu1 %v1738_v3  ;;  %1538 = vmatprep.subr.bf16.mxu0 %v1739_v4  ;;  %v1785_v3 = vld [vmem:[#allocation8 + $0x28] sm:$0xff]   ;;  %v1786_v4 = vld [vmem:[#allocation8 + $0x20] sm:$0xff]  }
  0x70   :  { %1560 = vmatprep.subr.bf16.mxu1 %v1740_v5  ;;  %v1787_v5 = vld [vmem:[#allocation8 + $0x18] sm:$0xff]  }
  0x72   :  { %1539 = vmatpush3.bf16.msra.mxu0 %v1741_v6  ;;  %v1788_v6 = vld [vmem:[#allocation8 + $0x10] sm:$0xff]  }
  0x73   :  { %1561 = vmatpush3.bf16.msra.mxu1 %v1742_v7  ;;  %1568 = vmatprep.subr.bf16.mxu0 %v1743_v16 }
  0x74   :  { %1590 = vmatprep.subr.bf16.mxu1 %v1744_v17 }
  0x75   :  { %993 = vmatmul.mubr.bf16.vlgmr.msra.gmra.mxu0 %v97_v14 }
  0x76   :  { %1033 = vmatmul.mubr.bf16.vlgmr.msra.gmra.mxu1 %v99_v15  ;;  %1569 = vmatpush3.bf16.msra.mxu0 %v1745_v18 }
  0x77   :  { %1591 = vmatpush3.bf16.msra.mxu1 %v1746_v19  ;;  %1570 = vmatprep.subr.bf16.mxu0 %v1747_v20 }
  0x78   :  { %1592 = vmatprep.subr.bf16.mxu1 %v1748_v21  ;;  %1072 = vmatprep.mubr.bf16.mxu0 %v102_v49 }
  0x79   :  { %1112 = vmatprep.mubr.bf16.mxu1 %v104_v53 }
  0x7a   :  { %1571 = vmatpush3.bf16.msra.mxu0 %v1749_v22 }
  0x7b   :  { %1593 = vmatpush3.bf16.msra.mxu1 %v1750_v23  ;;  %1572 = vmatprep.subr.bf16.mxu0 %v1751_v24  ;;  %v1365_v24 = vld [vmem:[%s2001_s2] ss:$0 sm:$0xff] }
  0x7c   :  { %1594 = vmatprep.subr.bf16.mxu1 %v1752_v25 }
  0x7e   :  { %1573 = vmatpush3.bf16.msra.mxu0 %v1753_v26 }
  0x7f   :  { %1595 = vmatpush3.bf16.msra.mxu1 %v1754_v27  ;;  %1574 = vmatprep.subr.bf16.mxu0 %v1755_v28 }
  0x80   :  { %1596 = vmatprep.subr.bf16.mxu1 %v1756_v29 }
  0x82   :  { %1575 = vmatpush3.bf16.msra.mxu0 %v1757_v30 }
  0x83   :  { %1597 = vmatpush3.bf16.msra.mxu1 %v1758_v31  ;;  %1576 = vmatprep.subr.bf16.mxu0 %v1759_v32 }
  0x84   :  { %1598 = vmatprep.subr.bf16.mxu1 %v1760_v33 }
  0x86   :  { %1577 = vmatpush3.bf16.msra.mxu0 %v1761_v34 }
  0x87   :  { %1599 = vmatpush3.bf16.msra.mxu1 %v1762_v35  ;;  %1578 = vmatprep.subr.bf16.mxu0 %v1763_v36 }
  0x88   :  { %1600 = vmatprep.subr.bf16.mxu1 %v1764_v37 }
  0x8a   :  { %1579 = vmatpush3.bf16.msra.mxu0 %v1765_v38 }
  0x8b   :  { %1601 = vmatpush3.bf16.msra.mxu1 %v1766_v39  ;;  %1580 = vmatprep.subr.bf16.mxu0 %v1767_v40 }
  0x8c   :  { %1602 = vmatprep.subr.bf16.mxu1 %v1768_v41 }
  0x8e   :  { %1581 = vmatpush3.bf16.msra.mxu0 %v1769_v42 }
  0x8f   :  { %1603 = vmatpush3.bf16.msra.mxu1 %v1770_v43  ;;  %1582 = vmatprep.subr.bf16.mxu0 %v1771_v44 }
  0x90   :  { %1604 = vmatprep.subr.bf16.mxu1 %v1772_v45 }
  0x92   :  { %1583 = vmatpush3.bf16.msra.mxu0 %v1773_v46  ;;  %v1789_v46 = vld [vmem:[#allocation8 + $0x8] sm:$0xff]  }
  0x93   :  { %1605 = vmatpush3.bf16.msra.mxu1 %v1774_v47  ;;  %1630 = vmatprep.subr.bf16.mxu0 %v1905_v57  ;;  %v1790_v47 = vld [vmem:[#allocation8] sm:$0xff]  }
  0x94   :  { %1650 = vmatprep.subr.bf16.mxu1 %v1905_v57 }
  0x95   :  { %1073 = vmatmul.mubr.bf16.vlgmr.msra.gmra.mxu0 %v101_v54 }
  0x96   :  { %1113 = vmatmul.mubr.bf16.vlgmr.msra.gmra.mxu1 %v103_v55  ;;  %1631 = vmatpush3.bf16.msra.mxu0 %v1775_v56  ;;  %v1471_v56 = vld [vmem:[%s2005_s6] ss:$0 sm:$0xff] }
  0x97   :  { %1632 = vmatprep.subr.bf16.mxu0 %v1905_v57  ;;  %1646 = vmatprep.mubr.msk.bf16.mxu0 %vm1906_vm0, %v1905_v57 }
  0x98   :  { %1666 = vmatprep.mubr.msk.bf16.mxu1 %vm1906_vm0, %v1905_v57  ;;  %1651 = vmatpush3.bf16.msra.mxu1 %v1783_v1 }
  0x99   :  { %1652 = vmatprep.subr.bf16.mxu1 %v1905_v57 }
  0x9a   :  { %1633 = vmatpush3.bf16.msra.mxu0 %v1776_v58 }
  0x9b   :  { %1634 = vmatprep.subr.bf16.mxu0 %v1905_v57 }
  0x9c   :  { %1653 = vmatpush3.bf16.msra.mxu1 %v1784_v2 }
  0x9d   :  { %1654 = vmatprep.subr.bf16.mxu1 %v1905_v57 }
  0x9e   :  { %1635 = vmatpush3.bf16.msra.mxu0 %v1777_v59 }
  0x9f   :  { %1636 = vmatprep.subr.bf16.mxu0 %v1905_v57 }
  0xa0   :  { %1655 = vmatpush3.bf16.msra.mxu1 %v1785_v3 }
  0xa1   :  { %1656 = vmatprep.subr.bf16.mxu1 %v1905_v57 }
  0xa2   :  { %1637 = vmatpush3.bf16.msra.mxu0 %v1778_v60 }
  0xa3   :  { %1638 = vmatprep.subr.bf16.mxu0 %v1905_v57 }
  0xa4   :  { %1657 = vmatpush3.bf16.msra.mxu1 %v1786_v4 }
  0xa5   :  { %1658 = vmatprep.subr.bf16.mxu1 %v1905_v57 }
  0xa6   :  { %1639 = vmatpush3.bf16.msra.mxu0 %v1779_v61 }
  0xa7   :  { %1640 = vmatprep.subr.bf16.mxu0 %v1905_v57 }
  0xa8   :  { %1659 = vmatpush3.bf16.msra.mxu1 %v1787_v5 }
  0xa9   :  { %1660 = vmatprep.subr.bf16.mxu1 %v1905_v57 }
  0xaa   :  { %1641 = vmatpush3.bf16.msra.mxu0 %v1780_v62 }
  0xab   :  { %1642 = vmatprep.subr.bf16.mxu0 %v1905_v57 }
  0xac   :  { %1661 = vmatpush3.bf16.msra.mxu1 %v1788_v6 }
  0xad   :  { %1662 = vmatprep.subr.bf16.mxu1 %v1905_v57 }
  0xae   :  { %1643 = vmatpush3.bf16.msra.mxu0 %v1781_v63 }
  0xaf   :  { %1644 = vmatprep.subr.bf16.mxu0 %v1905_v57 }
  0xb0   :  { %1663 = vmatpush3.bf16.msra.mxu1 %v1789_v46 }
  0xb1   :  { %1664 = vmatprep.subr.bf16.mxu1 %v1905_v57 }
  0xb2   :  { %1645 = vmatpush3.bf16.msra.mxu0 %v1782_v0 }
  0xb4   :  { %1665 = vmatpush3.bf16.msra.mxu1 %v1790_v47 }
 0x115   :  { %v1496_v7 = vpop.f32.mrf.mxu0 }
 0x116   :  { %v1518_v8 = vpop.f32.mrf.mxu1 }
 0x117   :  { %v1497_v9 = vpop.f32.mrf.mxu0 }
 0x118   :  { %v1519_v10 = vpop.f32.mrf.mxu1  ;;  %v1498_v23 = vadd.f32 %v1497_v9, %v1496_v7 }
 0x119   :  { %v1499_v11 = vpop.f32.mrf.mxu0  ;;  %v1520_v26 = vadd.f32 %v1519_v10, %v1518_v8 }
 0x11a   :  { %v1521_v12 = vpop.f32.mrf.mxu1  ;;  %v915_v25 = vadd.f32 %v1498_v23, %v1365_v24 }
 0x11b   :  { %v1500_v13 = vpop.f32.mrf.mxu0 }
 0x11c   :  { %v1522_v14 = vpop.f32.mrf.mxu1  ;;  %v955_v28 = vadd.f32 %v1520_v26, %v915_v25 }
 0x135   :  { %v1540_v15 = vpop.f32.mrf.mxu0 }
 0x136   :  { %v1562_v16 = vpop.f32.mrf.mxu1 }
 0x137   :  { %v1541_v17 = vpop.f32.mrf.mxu0 }
 0x138   :  { %v1563_v18 = vpop.f32.mrf.mxu1  ;;  %v1542_v27 = vadd.f32 %v1541_v17, %v1540_v15 }
 0x139   :  { %v1543_v19 = vpop.f32.mrf.mxu0  ;;  %v1564_v30 = vadd.f32 %v1563_v18, %v1562_v16 }
 0x13a   :  { %v1565_v20 = vpop.f32.mrf.mxu1  ;;  %v995_v29 = vadd.f32 %v1542_v27, %v955_v28 }
 0x13b   :  { %v1544_v21 = vpop.f32.mrf.mxu0 }
 0x13c   :  { %v1566_v22 = vpop.f32.mrf.mxu1  ;;  %v1035_v34 = vadd.f32 %v1564_v30, %v995_v29 }
 0x155   :  { %v1584_v31 = vpop.f32.mrf.mxu0 }
 0x156   :  { %v1606_v32 = vpop.f32.mrf.mxu1 }
 0x157   :  { %v1585_v33 = vpop.f32.mrf.mxu0 }
 0x158   :  { %v1586_v35 = vadd.f32 %v1585_v33, %v1584_v31  ;;  %v1607_v36 = vpop.f32.mrf.mxu1 }
 0x159   :  { %v1587_v37 = vpop.f32.mrf.mxu0  ;;  %v1608_v39 = vadd.f32 %v1607_v36, %v1606_v32 }
 0x15a   :  { %v1075_v38 = vadd.f32 %v1586_v35, %v1035_v34  ;;  %v1609_v40 = vpop.f32.mrf.mxu1 }
 0x15b   :  { %v1588_v41 = vpop.f32.mrf.mxu0 }
 0x15c   :  { %v1115_v42 = vadd.f32 %v1608_v39, %v1075_v38  ;;  %v1610_v43 = vpop.f32.mrf.mxu1 }
 0x15e   :  { %v1120_v44 = vmax.f32 %v1115_v42, 0.0 }
 0x160   :  { %v1121_v45 = vpack.c.bf16 %v1120_v44, %v1120_v44 }
 0x162   :  { %1647 = vmatmul.mubr.bf16.vlgmr.msra.gmra.mxu0 %v1121_v45 }
 0x222   :  { %v1227_v49 = vpop.f32.mrf.mxu0 }
 0x223   :  { %v1228_v50 = vadd.f32 %v1462_v48, %v1227_v49 }
 0x224   :  { %v1648_v51 = vpop.f32.mrf.mxu0 }
 0x225   :  { %v1233_v52 = vmax.f32 %v1228_v50, 0.0 }
 0x226   :  { %v1230_v53 = vpop.f32.mrf.mxu0 }
 0x227   :  { %v1234_v54 = vpack.c.bf16 %v1233_v52, %v1233_v52 }
 0x228   :  { %v1649_v55 = vpop.f32.mrf.mxu0 }
 0x229   :  { %1667 = vmatmul.mubr.bf16.vlgmr.msra.gmra.mxu1 %v1234_v54 }
 0x2e9   :  { %v1340_v57 = vpop.f32.mrf.mxu1 }
 0x2ea   :  { %v1341_v58 = vadd.f32 %v1471_v56, %v1340_v57 }
 0x2eb   :  { %v1668_v59 = vpop.f32.mrf.mxu1 }
 0x2ec   :  { %1347 = vst.msk [vmem:[#allocation10] sm:$0xff] %vm1346_vm1, %v1341_v58 }
 0x2ed   :  { %v1343_v60 = vpop.f32.mrf.mxu1 }
 0x2ee   :  { %1882 = shalt.err (!%p1879_p10)
}
 0x2ef   :  { %1357 = dma.vmem_to_hbm [thread:$0]  %s1355_s25, 128, %s2006_s7, [#allocation4]   ;;  %v1669_v61 = vpop.f32.mrf.mxu1 }
 0x2f0   :  { %1897 = dma.done.wait [#allocation4], 128  }
 0x2f1   :  { %1898 = vsyncadd [#allocation4], 4294967168 }
 0x2f2   :  { %1361 = vsyncpa [#allocation3], 1 }
 0x2f3   :  { %1362 = vsyncpa [#allocation6], 1 }
 0x2f4   :  { %1363 = vsyncpa [#allocation9], 1 }
 0x2f5   :  { %1364 = vsyncpa [#allocation4], 1 }

</bundles_post_ra>
